<compile_context>
chip_gen: v7x
topology: tpu7x:2x2x1
jax: 0.10.0
libtpu: 0.0.40
codegen_flags: <defaults>
</compile_context>

<pallas_src>
import jax
import jax.numpy as jnp
from jax.experimental import pallas as pl
from jax.experimental.pallas import tpu as pltpu


def _drop_path_kernel(x_ref, scale_ref, o_ref):
    # scale_ref is (TB, 1) holding 0 or 1/keep_prob per sample; broadcasts
    # over the (TB, TF) activation tile. Pure VPU multiply, HBM-bound.
    o_ref[...] = x_ref[...] * scale_ref[...]


def _tpu_generation():
    """Best-effort TPU generation detection (5 / 6 / 7); 0 if unknown."""
    try:
        kind = jax.devices()[0].device_kind.lower()
    except Exception:
        return 0
    for gen in (7, 6, 5):
        if f"v{gen}" in kind:
            return gen
    return 0


def _target_block_bytes(gen):
    # v7x: 3.2 TB/s/TC HBM makes the ~0.35 us/step overhead expensive -> big
    #      blocks, but only 64 MiB VMEM so pair with explicit vmem_limit.
    # v6e: ~4 MiB (4 x block = 16 MiB fits the 32 MiB default scoped VMEM).
    # v5e: 2 MiB already amortizes the step overhead to <7% at 0.82 TB/s and
    #      stays well under the 16 MiB default scoped VMEM.
    return {
        7: 6 * 1024 * 1024,
        6: 4 * 1024 * 1024,
        5: 2 * 1024 * 1024,
    }.get(gen, 2 * 1024 * 1024)


def _sublane_granularity(itemsize):
    # Packed sublane granularity: 8 rows f32, 16 bf16, 32 int8/fp8.
    return max(8, 32 // itemsize)


def _choose_block(batch, feat, itemsize, target_bytes):
    """Pick (tb, tf) respecting the (8,128) tiling rule and ~target_bytes."""
    g = _sublane_granularity(itemsize)

    # Lane (last-dim) tile: size it assuming tb == g, so the resulting block is
    # ~target_bytes rather than g * target_bytes.  When tf < feat it must be a
    # multiple of 128 (the ragged tail column is masked by Pallas).
    tf_cap = max(128, (target_bytes // (g * itemsize)) // 128 * 128)
    tf = feat if feat <= tf_cap else tf_cap

    # Sublane (batch) tile: batch samples until the block reaches target_bytes.
    rows = max(1, target_bytes // max(1, tf * itemsize))
    if rows >= batch:
        tb = batch
    else:
        tb = min(batch, max(g, (rows // g) * g))
        if tb >= batch:
            tb = batch
    return tb, tf


def _ensure_multi_block(batch, feat, itemsize, tb, tf):
    """Split a single-block grid so v7x's 2 TensorCores both get work."""
    g = _sublane_granularity(itemsize)
    total_bytes = batch * feat * itemsize
    if pl.cdiv(batch, tb) * pl.cdiv(feat, tf) > 1 or total_bytes < (1 << 20):
        return tb, tf
    if batch >= 2 * g:
        tb = max(g, ((batch // 2) // g) * g)
    elif feat >= 256:
        tf = max(128, ((feat // 2) // 128) * 128)
    return tb, tf


def drop_path(x, seed, drop_prob=0.0, training=False):
    """Pallas equivalent of drop_rate(x, drop_prob, training)."""
    if drop_prob == 0.0 or not training:
        return x
    keep_prob = 1.0 - drop_prob
    if keep_prob <= 0.0:
        # torch's x.div(0) * 0 would yield NaN; dropping every sample is the
        # only sensible limit of the op.
        return jnp.zeros_like(x)

    batch = x.shape[0]
    orig_shape = x.shape
    x2d = x.reshape(batch, -1)          # lane-dense layout plumbing (free)
    feat = x2d.shape[1]
    itemsize = jnp.dtype(x.dtype).itemsize

    # Per-sample Bernoulli(keep_prob) draw hoisted out of the kernel; the
    # kernel is a pure broadcast multiply by 0 or 1/keep_prob.
    # TODO(synk): RNG stream differs bit-for-bit from torch.rand (different
    # generator); semantics (per-sample Bernoulli(keep_prob), scaled) match.
    u = jax.random.uniform(jax.random.PRNGKey(seed), (batch, 1), dtype=jnp.float32)
    keep = jnp.floor(keep_prob + u)                       # {0., 1.} per sample
    scale = (keep * (1.0 / keep_prob)).astype(x.dtype)    # (B, 1): 0 or 1/keep_prob

    gen = _tpu_generation()
    target = _target_block_bytes(gen)
    tb, tf = _choose_block(batch, feat, itemsize, target)
    tb, tf = _ensure_multi_block(batch, feat, itemsize, tb, tf)
    grid = (pl.cdiv(batch, tb), pl.cdiv(feat, tf))

    # Zero data reuse: one full HBM read + write of the activation.
    cost = pl.CostEstimate(
        flops=batch * feat,
        transcendentals=0,
        bytes_accessed=2 * batch * feat * itemsize + batch * itemsize,
    )
    compiler_params = pltpu.CompilerParams(
        dimension_semantics=("parallel", "parallel"),
        # v7x has only 64 MiB physical VMEM; keep headroom for the
        # double-buffered in/out blocks of its larger block target.
        vmem_limit_bytes=(48 * 1024 * 1024 if gen == 7 else None),
    )

    # TODO(synk): for high drop rates, a PrefetchScalarGridSpec index_map could
    # skip streaming x for dropped row-blocks (saves ~drop_prob of read bytes);
    # better still, fuse this multiply into the adjacent residual-add consumer.
    out2d = pl.pallas_call(
        _drop_path_kernel,
        out_shape=jax.ShapeDtypeStruct((batch, feat), x.dtype),
        grid_spec=pl.GridSpec(
            grid=grid,
            in_specs=[
                pl.BlockSpec((tb, tf), lambda i, j: (i, j)),
                pl.BlockSpec((tb, 1), lambda i, j: (i, 0)),
            ],
            out_specs=pl.BlockSpec((tb, tf), lambda i, j: (i, j)),
        ),
        compiler_params=compiler_params,
        cost_estimate=cost,
    )(x2d, scale)
    return out2d.reshape(orig_shape)


def _drop_path_ref(x, seed, drop_prob):
    """Pure-JAX reference mirroring the wrapper's RNG stream."""
    keep_prob = 1.0 - drop_prob
    u = jax.random.uniform(jax.random.PRNGKey(seed), (x.shape[0], 1), dtype=jnp.float32)
    mask = jnp.floor(keep_prob + u).reshape((x.shape[0],) + (1,) * (x.ndim - 1))
    return (x / keep_prob) * mask.astype(x.dtype)


class DropPath:
    """Mirror of the PyTorch module; no parameters."""

    def __init__(self, drop_prob=None):
        self.drop_prob = drop_prob if drop_prob is not None else 0.0
        self.training = True

    def __call__(self, x, seed=0):
        return drop_path(x, seed, self.drop_prob, self.training)


if __name__ == "__main__":
    key = jax.random.PRNGKey(0)
    B, N, D = 2, 8, 32
    x = jax.random.normal(key, (B, N, D), dtype=jnp.float32)

    # training=True -> exercises the kernel
    drop_prob = 0.5
    mod = DropPath(drop_prob=drop_prob)
    y = jax.block_until_ready(mod(x, seed=0))
    assert y.shape == x.shape and y.dtype == x.dtype

    # matches the pure-JAX reference exactly (same RNG stream)
    y_ref = _drop_path_ref(x, 0, drop_prob)
    assert bool(jnp.allclose(y, y_ref, atol=1e-6))

    # each sample is either zeroed or scaled by exactly 1/keep_prob
    keep_prob = 1.0 - drop_prob
    for b in range(B):
        ok_keep = bool(jnp.allclose(y[b], x[b] / keep_prob, atol=1e-5))
        ok_drop = bool(jnp.allclose(y[b], 0.0, atol=1e-6))
        assert ok_keep or ok_drop

    # a second configuration (different drop rate / seed) still matches
    y2 = jax.block_until_ready(drop_path(x, seed=3, drop_prob=0.1, training=True))
    assert bool(jnp.allclose(y2, _drop_path_ref(x, 3, 0.1), atol=1e-6))

    # bf16 path (exercises the packed-sublane granularity logic)
    xb = x.astype(jnp.bfloat16)
    yb = jax.block_until_ready(drop_path(xb, seed=0, drop_prob=drop_prob, training=True))
    assert yb.shape == xb.shape and yb.dtype == jnp.bfloat16
    assert bool(jnp.allclose(yb.astype(jnp.float32),
                             _drop_path_ref(xb, 0, drop_prob).astype(jnp.float32),
                             atol=1e-2, rtol=1e-2))

    # eval mode -> identity (matches torch semantics: returns x unchanged)
    mod.training = False
    y_eval = jax.block_until_ready(mod(x))
    assert bool(jnp.all(y_eval == x))

    print("KERNEL_OK")
</pallas_src>

<mosaic_0001>
module attributes {stable_mosaic.version = 11 : i64} {
  func.func @_drop_path_kernel(%arg0: i32, %arg1: i32, %arg2: memref<2x256xf32, #tpu.memory_space<vmem>>, %arg3: memref<2x1xf32, #tpu.memory_space<vmem>>, %arg4: memref<2x256xf32, #tpu.memory_space<vmem>>) attributes {dimension_semantics = [#tpu.dimension_semantics<parallel>, #tpu.dimension_semantics<parallel>], iteration_bounds = array<i64: 1, 1>, scalar_prefetch = 0 : i64, scratch_operands = 0 : i64, tpu.core_type = #tpu.core_type<tc>, window_params = [{transform_indices = @transform_0, window_bounds = array<i64: 2, 256>}, {transform_indices = @transform_1, window_bounds = array<i64: 2, 1>}, {transform_indices = @transform_2, window_bounds = array<i64: 2, 256>}]} {
    %c0 = arith.constant 0 : index
    %c0_0 = arith.constant 0 : index
    %0 = vector.load %arg2[%c0, %c0_0] : memref<2x256xf32, #tpu.memory_space<vmem>>, vector<2x256xf32>
    %c0_1 = arith.constant 0 : index
    %c0_2 = arith.constant 0 : index
    %1 = vector.load %arg3[%c0_1, %c0_2] : memref<2x1xf32, #tpu.memory_space<vmem>>, vector<2x1xf32>
    %2 = vector.broadcast %1 : vector<2x1xf32> to vector<2x256xf32>
    %3 = arith.mulf %0, %2 : vector<2x256xf32>
    %c0_3 = arith.constant 0 : index
    %c0_4 = arith.constant 0 : index
    %4 = vector.load %arg4[%c0_3, %c0_4] : memref<2x256xf32, #tpu.memory_space<vmem>>, vector<2x256xf32>
    tpu.vector_store %arg4[%c0_3, %c0_4], %3 {strides = array<i32>} : memref<2x256xf32, #tpu.memory_space<vmem>>, vector<2x256xf32>,
    return
  }
  func.func @transform_0(%arg0: i32, %arg1: i32) -> (i32, i32) {
    %c0_i32 = arith.constant 0 : i32
    return %arg0, %arg1 : i32, i32
  }
  func.func @transform_1(%arg0: i32, %arg1: i32) -> (i32, i32) {
    %c0_i32 = arith.constant 0 : i32
    %c0_i32_0 = arith.constant 0 : i32
    return %arg0, %c0_i32 : i32, i32
  }
  func.func @transform_2(%arg0: i32, %arg1: i32) -> (i32, i32) {
    %c0_i32 = arith.constant 0 : i32
    return %arg0, %arg1 : i32, i32
  }
}

</mosaic_0001>

<bundles_post_ra>
// kernel: tpu_custom_call.1
= control target key start
LH: loop header
LB: loop body
LE: loop exit
PB: predicated region body
PF: predicated region fallthrough
CT: control target
= control target key end

     0   :  { %7 = vsyncpa [#allocation3], 0  ;;  %s154_s0 = inlined_call_operand.hbm [shape: f32[2,256], index: 0, kind: input, shape index: {}]   ;;  %s155_s1 = inlined_call_operand.vmem [shape: f32[2,1], index: 1, kind: input, shape index: {}]   ;;  %s156_s2 = inlined_call_operand.hbm [shape: f32[2,256], index: 2, kind: output, shape index: {}]  }
   0x1   :  { %8 = vsyncpa [#allocation4], 0  ;;  %s108_s9 = smov [#allocation2]   ;;  %s60_s13 = scalar_lea.hbm %s154_s0, 64 }
   0x2   :  { %s15_s10 = sshll.u32 %s108_s9, 4  ;;  %p61_p0 = scmp.ne.s32.totalorder %s154_s0, %s60_s13  ;;  %s16_s10 = int_to_ptr.vmem [resolvable:$true] %s15_s10 }
   0x3   :  { %p64_p1 = scmp.lt.u32.totalorder %s60_s13, %s154_s0 }
   0x5   :  { %p66_p2 = pnand %p64_p1, %p61_p0 }
   0x7   :  { %69 = shalt.err (!%p66_p2)
}
   0x8   :  { %s70_s18 = scalar_lea.vmem %s16_s10, 64  ;;  %p75_p4 = scmp.lt.s32.totalorder %s16_s10, %s16_s10 }
   0x9   :  { %p71_p3 = scmp.ne.s32.totalorder %s16_s10, %s70_s18  ;;  %p76_p5 = scmp.lt.s32.totalorder %s70_s18, %s70_s18 }
   0xb   :  { %p77_p6 = por %p76_p5, %p75_p4 }
   0xd   :  { %p78_p7 = pnand %p77_p6, %p71_p3 }
   0xf   :  { %81 = shalt.err (!%p78_p7)
}
  0x10   :  { %18 = dma.hbm_to_vmem [thread:$0]  %s154_s0, 64, %s16_s10, [#allocation3]  }
  0x11   :  { %104 = dma.done.wait [#allocation3], 64  }
  0x12   :  { %105 = vsyncadd [#allocation3], 4294967232  ;;  %v109_v0 = vmov 0   ;;  %v25_v1 = vld [vmem:[%s155_s1] sm:$0x3]  ;;  %v33_v4 = vlaneseq  ;;  %s111_s23 = smov [#allocation5]  }
  0x13   :  { %59 = vset.pattern.permute.xlu0 %v109_v0  ;;  %v110_v2 = vmov 269488144   ;;  %v24_v9 = vld [vmem:[#allocation2] sm:$0xf]  ;;  %s46_s24 = sshll.u32 %s111_s23, 4  ;;  %s47_s24 = int_to_ptr.vmem [resolvable:$true] %s46_s24 }
  0x14   :  { %28 = vperm.xlu0 %59, %v25_v1   ;;  %v31_v3 = vunpack.c.l.s4 %v110_v2  ;;  %v34_v6 = vshrl.u32 %v33_v4, 7  ;;  %s82_s0 = scalar_lea.vmem %s47_s24, 64  ;;  %p87_p9 = scmp.lt.s32.totalorder %s47_s24, %s47_s24 }
  0x15   :  { %p83_p8 = scmp.ne.s32.totalorder %s47_s24, %s82_s0  ;;  %p88_p10 = scmp.lt.s32.totalorder %s82_s0, %s82_s0 }
  0x16   :  { %v32_v5 = vunpack.c.0.s8 %v31_v3 }
  0x17   :  { %p89_p11 = por %p88_p10, %p87_p9 }
  0x18   :  { %v35_v7 = vsub.s32 %v32_v5, %v34_v6 }
  0x19   :  { %p90_p12 = pnand %p89_p11, %p83_p8 }
  0x93   :  { %v29_v8 = vpop.permute.xlu0 %28 }
  0x94   :  { %v36_v10 = vrot.slane %v29_v8, %v35_v7 }
  0x96   :  { %v38_v11 = vmul.f32 %v36_v10, %v24_v9 }
  0x98   :  { %39 = vst [vmem:[#allocation5] sm:$0xf] %v38_v11 }
  0x99   :  { %93 = shalt.err (!%p90_p12)
}
  0x9a   :  { %s94_s26 = scalar_lea.hbm %s156_s2, 64 }
  0x9b   :  { %p95_p13 = scmp.ne.s32.totalorder %s156_s2, %s94_s26  ;;  %p98_p0 = scmp.lt.u32.totalorder %s94_s26, %s156_s2 }
  0x9d   :  { %p100_p1 = pnand %p98_p0, %p95_p13 }
  0x9f   :  { %103 = shalt.err (!%p100_p1)
}
  0xa0   :  { %49 = dma.vmem_to_hbm [thread:$0]  %s47_s24, 64, %s156_s2, [#allocation4]  }
  0xa1   :  { %106 = dma.done.wait [#allocation4], 64  }
  0xa2   :  { %107 = vsyncadd [#allocation4], 4294967232 }
  0xa3   :  { %53 = vsyncpa [#allocation3], 1 }
  0xa4   :  { %54 = vsyncpa [#allocation4], 1 }

</bundles_post_ra>
